<compile_context>
chip_gen: v7x
topology: tpu7x:2x2x1
jax: 0.10.0
libtpu: 0.0.40
codegen_flags: <defaults>
</compile_context>

<pallas_src>
import functools
import math

import jax
import jax.numpy as jnp
from jax import lax
from jax.experimental import pallas as pl
from jax.experimental.pallas import tpu as pltpu


# ------------------------------ Pallas kernel -------------------------------

def _birnn_fused_kernel(xw0_ref, whh_ref, m1_ref, m2_ref, b_ref,
                        out_ref, hid_ref, xrev_ref, xw_ref,
                        *, seq_len, batch, hidden, num_layers):
    """All bidirectional RNN layers, whole (padded) sequence resident in VMEM.

    xw0_ref:  (T*Bp, 2H)  layer-0 recurrence-ready input projection
                          row t*Bp+b = [x(t)@Wf0^T+bf0 , x(T-1-t)@Wb0^T+bb0]
    whh_ref:  (L, 2H, 2H) per-layer block-diagonal [[Whh_f^T,0],[0,Whh_b^T]]
    m1_ref:   (L-1, 2H, 2H)  projection weights acting on the packed hidden slab
    m2_ref:   (L-1, 2H, 2H)  projection weights acting on the time-reversed slab
    b_ref:    (L-1, 1, 2H)   combined biases for layers >= 1
    out_ref:  (Bp, 2H)     last-timestep hidden [h_f(T-1), h_b(T-1)] (proper order)
    hid_ref, xrev_ref, xw_ref: (T*Bp, 2H) VMEM scratch slabs
    """
    T, Bp, H = seq_len, batch, hidden
    H2 = 2 * hidden
    unroll = min(T, 8)

    # Layer-0 projection was computed lane-dense in the XLA wrapper.
    xw_ref[...] = xw0_ref[...]

    for layer in range(num_layers):
        whh_bd = whh_ref[layer]                    # (2H, 2H) -- loop invariant, in vregs

        # --- sequential recurrence: one fused matmul + tanh + 64-lane store per step ---
        def step(t, h):
            row = pl.multiple_of(t * Bp, 8)
            h = jnp.tanh(xw_ref[pl.ds(row, Bp), :]
                         + jnp.dot(h, whh_bd, preferred_element_type=jnp.float32))
            hid_ref[pl.ds(row, Bp), :] = h         # packed: [h_f(t), h_b(T-1-t)]
            return h

        lax.fori_loop(0, T, step, jnp.zeros((Bp, H2), jnp.float32), unroll=unroll)

        if layer + 1 < num_layers:
            # --- parallel phase (off the critical path) ---------------------------------
            # Full-row (lane-dense) time reversal of the packed hidden slab.
            def rev(t, carry):
                dst = pl.multiple_of(t * Bp, 8)
                src = pl.multiple_of((T - 1 - t) * Bp, 8)
                xrev_ref[pl.ds(dst, Bp), :] = hid_ref[pl.ds(src, Bp), :]
                return carry

            lax.fori_loop(0, T, rev, 0, unroll=unroll)

            # Next layer's recurrence-ready projection:
            #   row t = [x(t)@Wf^T + bf , x(T-1-t)@Wb^T + bb]
            # expressed over the packed hid/xrev slabs via the M1/M2 weight split.
            xw_ref[...] = (
                jnp.dot(hid_ref[...], m1_ref[layer], preferred_element_type=jnp.float32)
                + jnp.dot(xrev_ref[...], m2_ref[layer], preferred_element_type=jnp.float32)
                + b_ref[layer])

    # Last-timestep hidden in proper order:
    #   fwd h(T-1) lives in row-block T-1 lanes [0,H); bwd h(T-1) in row-block 0 lanes [H,2H).
    last = pl.multiple_of((T - 1) * Bp, 8)
    out_ref[:, pl.ds(0, H)] = hid_ref[pl.ds(last, Bp), pl.ds(0, H)]
    out_ref[:, pl.ds(H, H)] = hid_ref[pl.ds(0, Bp), pl.ds(H, H)]


# -------------------------------- wrappers -----------------------------------

def _birnn_fused(xw0, whh_bd, m1, m2, bmid, *, seq_len, batch, hidden):
    H2 = 2 * hidden
    L = whh_bd.shape[0]
    n_mid = m1.shape[0]
    slab_bytes = seq_len * batch * H2 * 4
    weight_bytes = (L + 2 * n_mid) * H2 * H2 * 4 + n_mid * H2 * 4
    out_bytes = batch * H2 * 4

    kernel = functools.partial(_birnn_fused_kernel, seq_len=seq_len, batch=batch,
                               hidden=hidden, num_layers=L)
    vmem = pl.BlockSpec(memory_space=pltpu.MemorySpace.VMEM)

    cost = pl.CostEstimate(
        flops=(L + 2 * max(L - 1, 0)) * 2 * seq_len * batch * H2 * H2,
        transcendentals=L * seq_len * batch * H2,
        bytes_accessed=slab_bytes + weight_bytes + out_bytes)

    vmem_budget = 2 * (slab_bytes + weight_bytes + out_bytes) + 3 * slab_bytes + (1 << 20)

    return pl.pallas_call(
        kernel,
        out_shape=jax.ShapeDtypeStruct((batch, H2), jnp.float32),
        in_specs=[vmem, vmem, vmem, vmem, vmem],
        out_specs=vmem,
        scratch_shapes=[pltpu.VMEM((seq_len * batch, H2), jnp.float32),
                        pltpu.VMEM((seq_len * batch, H2), jnp.float32),
                        pltpu.VMEM((seq_len * batch, H2), jnp.float32)],
        compiler_params=pltpu.CompilerParams(
            vmem_limit_bytes=max(int(vmem_budget), 4 * 1024 * 1024)),
        cost_estimate=cost,
    )(xw0, whh_bd, m1, m2, bmid)


def _round_up(n, m):
    return ((n + m - 1) // m) * m


@jax.jit
def birnn_forward(prepared, x_btf):
    """Forward pass matching BiRNNModel.forward. x_btf: (B, T, input_size) -> (B, O)."""
    whh_bd = prepared["whh_bd"]                              # (L, 2H, 2H)
    H2 = whh_bd.shape[-1]
    H = H2 // 2
    B, T, _ = x_btf.shape
    Bp = _round_up(B, 8)                                     # sublane-align the batch

    x = jnp.transpose(x_btf, (1, 0, 2)).astype(jnp.float32)  # (T, B, F) time-major
    x = jnp.pad(x, ((0, 0), (0, Bp - B), (0, 0)))            # (T, Bp, F)

    # Layer-0 input projection in XLA (the kernel never sees a lane-sparse (., F) slab);
    # bwd half stored time-reversed so the kernel reads one contiguous row block per step.
    xw_f0 = jnp.einsum('tbf,fh->tbh', x, prepared["wih0_f_t"]) + prepared["b0_f"]
    xw_b0 = jnp.einsum('tbf,fh->tbh', x, prepared["wih0_b_t"]) + prepared["b0_b"]
    xw0 = jnp.concatenate([xw_f0, xw_b0[::-1]], axis=-1).reshape(T * Bp, H2)

    last = _birnn_fused(xw0, whh_bd, prepared["m1"], prepared["m2"], prepared["bmid"],
                        seq_len=T, batch=Bp, hidden=H)       # (Bp, 2H)
    # (inter-layer dropout is an inference no-op)

    # Final Linear is tiny -- keep it in plain XLA.
    return last[:B] @ prepared["lin_w_t"] + prepared["lin_b"]


# ---------------------- parameter init & preparation -------------------------

def init_params(key, input_size, hidden_size, output_size, num_layers):
    """PyTorch-layout params, U(-1/sqrt(H), 1/sqrt(H)) like nn.RNN / nn.Linear defaults."""
    params = {"rnn": []}
    bound_h = 1.0 / math.sqrt(hidden_size)
    for l in range(num_layers):
        in_f = input_size if l == 0 else 2 * hidden_size
        keys = jax.random.split(key, 9)
        key = keys[0]
        u = lambda k, shape: jax.random.uniform(k, shape, jnp.float32, -bound_h, bound_h)
        params["rnn"].append(dict(
            w_ih_f=u(keys[1], (hidden_size, in_f)),
            w_hh_f=u(keys[2], (hidden_size, hidden_size)),
            b_ih_f=u(keys[3], (hidden_size,)),
            b_hh_f=u(keys[4], (hidden_size,)),
            w_ih_b=u(keys[5], (hidden_size, in_f)),
            w_hh_b=u(keys[6], (hidden_size, hidden_size)),
            b_ih_b=u(keys[7], (hidden_size,)),
            b_hh_b=u(keys[8], (hidden_size,)),
        ))
    k1, k2, _ = jax.random.split(key, 3)
    bound_l = 1.0 / math.sqrt(2 * hidden_size)
    params["lin_w"] = jax.random.uniform(k1, (output_size, 2 * hidden_size),
                                         jnp.float32, -bound_l, bound_l)
    params["lin_b"] = jax.random.uniform(k2, (output_size,),
                                         jnp.float32, -bound_l, bound_l)
    return params


def prepare_params(params):
    """One-time host-side transform: fuse directions, pre-transpose, pre-combine biases."""
    rnn = params["rnn"]
    H = rnn[0]["w_hh_f"].shape[0]
    z = jnp.zeros((H, H), jnp.float32)

    whh_bd, m1s, m2s, bmids = [], [], [], []
    for l, p in enumerate(rnn):
        # Block-diagonal recurrent weight: packed h @ [[Whh_f^T,0],[0,Whh_b^T]].
        whh_bd.append(jnp.block([[p["w_hh_f"].T, z], [z, p["w_hh_b"].T]]))
        if l > 0:
            wf_t = p["w_ih_f"].T                              # (2H, H)
            wb_t = p["w_ih_b"].T                              # (2H, H)
            # xw_ready = hid @ M1 + rev_time(hid) @ M2 + b  (see kernel docstring).
            m1s.append(jnp.block([[wf_t[:H], z], [z, wb_t[H:]]]))
            m2s.append(jnp.block([[z, wb_t[:H]], [wf_t[H:], z]]))
            bmids.append(jnp.concatenate([p["b_ih_f"] + p["b_hh_f"],
                                          p["b_ih_b"] + p["b_hh_b"]]).reshape(1, -1))
    if not m1s:  # single-layer model: dummy (never read inside the kernel)
        m1s = [jnp.zeros((2 * H, 2 * H), jnp.float32)]
        m2s = [jnp.zeros((2 * H, 2 * H), jnp.float32)]
        bmids = [jnp.zeros((1, 2 * H), jnp.float32)]

    p0 = rnn[0]
    return dict(
        wih0_f_t=p0["w_ih_f"].T,                              # (F, H)
        wih0_b_t=p0["w_ih_b"].T,                              # (F, H)
        b0_f=p0["b_ih_f"] + p0["b_hh_f"],                     # (H,)
        b0_b=p0["b_ih_b"] + p0["b_hh_b"],                     # (H,)
        whh_bd=jnp.stack(whh_bd),                             # (L, 2H, 2H)
        m1=jnp.stack(m1s),                                    # (max(L-1,1), 2H, 2H)
        m2=jnp.stack(m2s),                                    # (max(L-1,1), 2H, 2H)
        bmid=jnp.stack(bmids),                                # (max(L-1,1), 1, 2H)
        lin_w_t=params["lin_w"].T,                            # (2H, O)
        lin_b=params["lin_b"].reshape(1, -1),                 # (1, O)
    )


# --------------------------- pure-JAX reference -------------------------------

def _ref_forward(params, x_btf):
    x = jnp.transpose(x_btf, (1, 0, 2)).astype(jnp.float32)   # (T, B, F)
    T, B, _ = x.shape
    layer_in = x
    for p in params["rnn"]:
        H = p["w_hh_f"].shape[0]

        def run(seq, wih, whh, bih, bhh):
            def step(h, xt):
                h = jnp.tanh(xt @ wih.T + h @ whh.T + bih + bhh)
                return h, h
            _, hs = lax.scan(step, jnp.zeros((B, H), jnp.float32), seq)
            return hs

        fwd = run(layer_in, p["w_ih_f"], p["w_hh_f"], p["b_ih_f"], p["b_hh_f"])
        bwd = run(layer_in[::-1], p["w_ih_b"], p["w_hh_b"],
                  p["b_ih_b"], p["b_hh_b"])[::-1]
        layer_in = jnp.concatenate([fwd, bwd], axis=-1)
    return layer_in[-1] @ params["lin_w"].T + params["lin_b"]


# ----------------------------------- main -------------------------------------

if __name__ == "__main__":
    # Small, module-consistent shapes (batch_first input like the PyTorch module).
    B, T = 2, 8
    INPUT_SIZE, HIDDEN, OUTPUT_SIZE, NUM_LAYERS = 4, 32, 4, 2

    key = jax.random.PRNGKey(0)
    k_param, k_x = jax.random.split(key)
    params = init_params(k_param, INPUT_SIZE, HIDDEN, OUTPUT_SIZE, NUM_LAYERS)
    prepared = prepare_params(params)
    x = jax.random.normal(k_x, (B, T, INPUT_SIZE), jnp.float32)   # (batch, seq, feature)

    out = jax.block_until_ready(birnn_forward(prepared, x))
    assert out.shape == (B, OUTPUT_SIZE), out.shape

    ref = jax.block_until_ready(_ref_forward(params, x))
    assert jnp.allclose(out, ref, atol=2e-5, rtol=2e-5), \
        "Pallas output mismatch vs JAX reference"

    print("KERNEL_OK")
</pallas_src>

<mosaic_0001>
module attributes {stable_mosaic.version = 11 : i64} {
  func.func @_birnn_fused_kernel(%arg0: memref<64x64xf32, #tpu.memory_space<vmem>>, %arg1: memref<2x64x64xf32, #tpu.memory_space<vmem>>, %arg2: memref<1x64x64xf32, #tpu.memory_space<vmem>>, %arg3: memref<1x64x64xf32, #tpu.memory_space<vmem>>, %arg4: memref<1x1x64xf32, #tpu.memory_space<vmem>>, %arg5: memref<8x64xf32, #tpu.memory_space<vmem>>, %arg6: memref<64x64xf32, #tpu.memory_space<vmem>>, %arg7: memref<64x64xf32, #tpu.memory_space<vmem>>, %arg8: memref<64x64xf32, #tpu.memory_space<vmem>>) attributes {dimension_semantics = [], scalar_prefetch = 0 : i64, scratch_operands = 3 : i64, tpu.core_type = #tpu.core_type<tc>} {
    %c0 = arith.constant 0 : index
    %c0_0 = arith.constant 0 : index
    %0 = vector.load %arg0[%c0, %c0_0] : memref<64x64xf32, #tpu.memory_space<vmem>>, vector<64x64xf32>
    %c0_1 = arith.constant 0 : index
    %c0_2 = arith.constant 0 : index
    %1 = vector.load %arg8[%c0_1, %c0_2] : memref<64x64xf32, #tpu.memory_space<vmem>>, vector<64x64xf32>
    tpu.vector_store %arg8[%c0_1, %c0_2], %0 {strides = array<i32>} : memref<64x64xf32, #tpu.memory_space<vmem>>, vector<64x64xf32>,
    %c0_3 = arith.constant 0 : index
    %c0_4 = arith.constant 0 : index
    %c0_5 = arith.constant 0 : index
    %2 = vector.load %arg1[%c0_3, %c0_4, %c0_5] : memref<2x64x64xf32, #tpu.memory_space<vmem>>, vector<1x64x64xf32>
    %3 = vector.shape_cast %2 : vector<1x64x64xf32> to vector<64x64xf32>
    %cst = arith.constant 0.000000e+00 : f32
    %4 = vector.broadcast %cst : f32 to vector<8x64xf32>
    %c0_i32 = arith.constant 0 : i32
    %c8_i32 = arith.constant 8 : i32
    %5 = arith.muli %c0_i32, %c8_i32 : i32
    %6 = tpu.assume_multiple %5, 8 : i32
    %7 = arith.index_cast %6 : i32 to index
    %c0_6 = arith.constant 0 : index
    %8 = vector.load %arg8[%7, %c0_6] : memref<64x64xf32, #tpu.memory_space<vmem>>, vector<8x64xf32>
    %cst_7 = arith.constant dense<0.000000e+00> : vector<8x64xf32>
    %9 = tpu.matmul %4, %3, %cst_7 {dimension_numbers = #tpu.dot_dimension_numbers<[1], [0], [0], [1], [0, 0, 1, 1], [], []>} : vector<8x64xf32>, vector<64x64xf32>, vector<8x64xf32> -> vector<8x64xf32>
    %10 = arith.addf %8, %9 : vector<8x64xf32>
    %11 = math.tanh %10 : vector<8x64xf32>
    %12 = arith.index_cast %6 : i32 to index
    %c0_8 = arith.constant 0 : index
    %13 = vector.load %arg6[%12, %c0_8] : memref<64x64xf32, #tpu.memory_space<vmem>>, vector<8x64xf32>
    tpu.vector_store %arg6[%12, %c0_8], %11 {strides = array<i32>} : memref<64x64xf32, #tpu.memory_space<vmem>>, vector<8x64xf32>,
    %c1_i32 = arith.constant 1 : i32
    %c8_i32_9 = arith.constant 8 : i32
    %14 = arith.muli %c1_i32, %c8_i32_9 : i32
    %15 = tpu.assume_multiple %14, 8 : i32
    %16 = arith.index_cast %15 : i32 to index
    %c0_10 = arith.constant 0 : index
    %17 = vector.load %arg8[%16, %c0_10] : memref<64x64xf32, #tpu.memory_space<vmem>>, vector<8x64xf32>
    %cst_11 = arith.constant dense<0.000000e+00> : vector<8x64xf32>
    %18 = tpu.matmul %11, %3, %cst_11 {dimension_numbers = #tpu.dot_dimension_numbers<[1], [0], [0], [1], [0, 0, 1, 1], [], []>} : vector<8x64xf32>, vector<64x64xf32>, vector<8x64xf32> -> vector<8x64xf32>
    %19 = arith.addf %17, %18 : vector<8x64xf32>
    %20 = math.tanh %19 : vector<8x64xf32>
    %21 = arith.index_cast %15 : i32 to index
    %c0_12 = arith.constant 0 : index
    %22 = vector.load %arg6[%21, %c0_12] : memref<64x64xf32, #tpu.memory_space<vmem>>, vector<8x64xf32>
    tpu.vector_store %arg6[%21, %c0_12], %20 {strides = array<i32>} : memref<64x64xf32, #tpu.memory_space<vmem>>, vector<8x64xf32>,
    %c2_i32 = arith.constant 2 : i32
    %c8_i32_13 = arith.constant 8 : i32
    %23 = arith.muli %c2_i32, %c8_i32_13 : i32
    %24 = tpu.assume_multiple %23, 8 : i32
    %25 = arith.index_cast %24 : i32 to index
    %c0_14 = arith.constant 0 : index
    %26 = vector.load %arg8[%25, %c0_14] : memref<64x64xf32, #tpu.memory_space<vmem>>, vector<8x64xf32>
    %cst_15 = arith.constant dense<0.000000e+00> : vector<8x64xf32>
    %27 = tpu.matmul %20, %3, %cst_15 {dimension_numbers = #tpu.dot_dimension_numbers<[1], [0], [0], [1], [0, 0, 1, 1], [], []>} : vector<8x64xf32>, vector<64x64xf32>, vector<8x64xf32> -> vector<8x64xf32>
    %28 = arith.addf %26, %27 : vector<8x64xf32>
    %29 = math.tanh %28 : vector<8x64xf32>
    %30 = arith.index_cast %24 : i32 to index
    %c0_16 = arith.constant 0 : index
    %31 = vector.load %arg6[%30, %c0_16] : memref<64x64xf32, #tpu.memory_space<vmem>>, vector<8x64xf32>
    tpu.vector_store %arg6[%30, %c0_16], %29 {strides = array<i32>} : memref<64x64xf32, #tpu.memory_space<vmem>>, vector<8x64xf32>,
    %c3_i32 = arith.constant 3 : i32
    %c8_i32_17 = arith.constant 8 : i32
    %32 = arith.muli %c3_i32, %c8_i32_17 : i32
    %33 = tpu.assume_multiple %32, 8 : i32
    %34 = arith.index_cast %33 : i32 to index
    %c0_18 = arith.constant 0 : index
    %35 = vector.load %arg8[%34, %c0_18] : memref<64x64xf32, #tpu.memory_space<vmem>>, vector<8x64xf32>
    %cst_19 = arith.constant dense<0.000000e+00> : vector<8x64xf32>
    %36 = tpu.matmul %29, %3, %cst_19 {dimension_numbers = #tpu.dot_dimension_numbers<[1], [0], [0], [1], [0, 0, 1, 1], [], []>} : vector<8x64xf32>, vector<64x64xf32>, vector<8x64xf32> -> vector<8x64xf32>
    %37 = arith.addf %35, %36 : vector<8x64xf32>
    %38 = math.tanh %37 : vector<8x64xf32>
    %39 = arith.index_cast %33 : i32 to index
    %c0_20 = arith.constant 0 : index
    %40 = vector.load %arg6[%39, %c0_20] : memref<64x64xf32, #tpu.memory_space<vmem>>, vector<8x64xf32>
    tpu.vector_store %arg6[%39, %c0_20], %38 {strides = array<i32>} : memref<64x64xf32, #tpu.memory_space<vmem>>, vector<8x64xf32>,
    %c4_i32 = arith.constant 4 : i32
    %c8_i32_21 = arith.constant 8 : i32
    %41 = arith.muli %c4_i32, %c8_i32_21 : i32
    %42 = tpu.assume_multiple %41, 8 : i32
    %43 = arith.index_cast %42 : i32 to index
    %c0_22 = arith.constant 0 : index
    %44 = vector.load %arg8[%43, %c0_22] : memref<64x64xf32, #tpu.memory_space<vmem>>, vector<8x64xf32>
    %cst_23 = arith.constant dense<0.000000e+00> : vector<8x64xf32>
    %45 = tpu.matmul %38, %3, %cst_23 {dimension_numbers = #tpu.dot_dimension_numbers<[1], [0], [0], [1], [0, 0, 1, 1], [], []>} : vector<8x64xf32>, vector<64x64xf32>, vector<8x64xf32> -> vector<8x64xf32>
    %46 = arith.addf %44, %45 : vector<8x64xf32>
    %47 = math.tanh %46 : vector<8x64xf32>
    %48 = arith.index_cast %42 : i32 to index
    %c0_24 = arith.constant 0 : index
    %49 = vector.load %arg6[%48, %c0_24] : memref<64x64xf32, #tpu.memory_space<vmem>>, vector<8x64xf32>
    tpu.vector_store %arg6[%48, %c0_24], %47 {strides = array<i32>} : memref<64x64xf32, #tpu.memory_space<vmem>>, vector<8x64xf32>,
    %c5_i32 = arith.constant 5 : i32
    %c8_i32_25 = arith.constant 8 : i32
    %50 = arith.muli %c5_i32, %c8_i32_25 : i32
    %51 = tpu.assume_multiple %50, 8 : i32
    %52 = arith.index_cast %51 : i32 to index
    %c0_26 = arith.constant 0 : index
    %53 = vector.load %arg8[%52, %c0_26] : memref<64x64xf32, #tpu.memory_space<vmem>>, vector<8x64xf32>
    %cst_27 = arith.constant dense<0.000000e+00> : vector<8x64xf32>
    %54 = tpu.matmul %47, %3, %cst_27 {dimension_numbers = #tpu.dot_dimension_numbers<[1], [0], [0], [1], [0, 0, 1, 1], [], []>} : vector<8x64xf32>, vector<64x64xf32>, vector<8x64xf32> -> vector<8x64xf32>
    %55 = arith.addf %53, %54 : vector<8x64xf32>
    %56 = math.tanh %55 : vector<8x64xf32>
    %57 = arith.index_cast %51 : i32 to index
    %c0_28 = arith.constant 0 : index
    %58 = vector.load %arg6[%57, %c0_28] : memref<64x64xf32, #tpu.memory_space<vmem>>, vector<8x64xf32>
    tpu.vector_store %arg6[%57, %c0_28], %56 {strides = array<i32>} : memref<64x64xf32, #tpu.memory_space<vmem>>, vector<8x64xf32>,
    %c6_i32 = arith.constant 6 : i32
    %c8_i32_29 = arith.constant 8 : i32
    %59 = arith.muli %c6_i32, %c8_i32_29 : i32
    %60 = tpu.assume_multiple %59, 8 : i32
    %61 = arith.index_cast %60 : i32 to index
    %c0_30 = arith.constant 0 : index
    %62 = vector.load %arg8[%61, %c0_30] : memref<64x64xf32, #tpu.memory_space<vmem>>, vector<8x64xf32>
    %cst_31 = arith.constant dense<0.000000e+00> : vector<8x64xf32>
    %63 = tpu.matmul %56, %3, %cst_31 {dimension_numbers = #tpu.dot_dimension_numbers<[1], [0], [0], [1], [0, 0, 1, 1], [], []>} : vector<8x64xf32>, vector<64x64xf32>, vector<8x64xf32> -> vector<8x64xf32>
    %64 = arith.addf %62, %63 : vector<8x64xf32>
    %65 = math.tanh %64 : vector<8x64xf32>
    %66 = arith.index_cast %60 : i32 to index
    %c0_32 = arith.constant 0 : index
    %67 = vector.load %arg6[%66, %c0_32] : memref<64x64xf32, #tpu.memory_space<vmem>>, vector<8x64xf32>
    tpu.vector_store %arg6[%66, %c0_32], %65 {strides = array<i32>} : memref<64x64xf32, #tpu.memory_space<vmem>>, vector<8x64xf32>,
    %c7_i32 = arith.constant 7 : i32
    %c8_i32_33 = arith.constant 8 : i32
    %68 = arith.muli %c7_i32, %c8_i32_33 : i32
    %69 = tpu.assume_multiple %68, 8 : i32
    %70 = arith.index_cast %69 : i32 to index
    %c0_34 = arith.constant 0 : index
    %71 = vector.load %arg8[%70, %c0_34] : memref<64x64xf32, #tpu.memory_space<vmem>>, vector<8x64xf32>
    %cst_35 = arith.constant dense<0.000000e+00> : vector<8x64xf32>
    %72 = tpu.matmul %65, %3, %cst_35 {dimension_numbers = #tpu.dot_dimension_numbers<[1], [0], [0], [1], [0, 0, 1, 1], [], []>} : vector<8x64xf32>, vector<64x64xf32>, vector<8x64xf32> -> vector<8x64xf32>
    %73 = arith.addf %71, %72 : vector<8x64xf32>
    %74 = math.tanh %73 : vector<8x64xf32>
    %75 = arith.index_cast %69 : i32 to index
    %c0_36 = arith.constant 0 : index
    %76 = vector.load %arg6[%75, %c0_36] : memref<64x64xf32, #tpu.memory_space<vmem>>, vector<8x64xf32>
    tpu.vector_store %arg6[%75, %c0_36], %74 {strides = array<i32>} : memref<64x64xf32, #tpu.memory_space<vmem>>, vector<8x64xf32>,
    %c8_i32_37 = arith.constant 8 : i32
    %c0_i32_38 = arith.constant 0 : i32
    %c8_i32_39 = arith.constant 8 : i32
    %77 = arith.muli %c0_i32_38, %c8_i32_39 : i32
    %78 = tpu.assume_multiple %77, 8 : i32
    %c7_i32_40 = arith.constant 7 : i32
    %79 = arith.subi %c7_i32_40, %c0_i32_38 : i32
    %c8_i32_41 = arith.constant 8 : i32
    %80 = arith.muli %79, %c8_i32_41 : i32
    %81 = tpu.assume_multiple %80, 8 : i32
    %82 = arith.index_cast %81 : i32 to index
    %c0_42 = arith.constant 0 : index
    %83 = vector.load %arg6[%82, %c0_42] : memref<64x64xf32, #tpu.memory_space<vmem>>, vector<8x64xf32>
    %84 = arith.index_cast %78 : i32 to index
    %c0_43 = arith.constant 0 : index
    %85 = vector.load %arg7[%84, %c0_43] : memref<64x64xf32, #tpu.memory_space<vmem>>, vector<8x64xf32>
    tpu.vector_store %arg7[%84, %c0_43], %83 {strides = array<i32>} : memref<64x64xf32, #tpu.memory_space<vmem>>, vector<8x64xf32>,
    %c1_i32_44 = arith.constant 1 : i32
    %c8_i32_45 = arith.constant 8 : i32
    %86 = arith.muli %c1_i32_44, %c8_i32_45 : i32
    %87 = tpu.assume_multiple %86, 8 : i32
    %c7_i32_46 = arith.constant 7 : i32
    %88 = arith.subi %c7_i32_46, %c1_i32_44 : i32
    %c8_i32_47 = arith.constant 8 : i32
    %89 = arith.muli %88, %c8_i32_47 : i32
    %90 = tpu.assume_multiple %89, 8 : i32
    %91 = arith.index_cast %90 : i32 to index
    %c0_48 = arith.constant 0 : index
    %92 = vector.load %arg6[%91, %c0_48] : memref<64x64xf32, #tpu.memory_space<vmem>>, vector<8x64xf32>
    %93 = arith.index_cast %87 : i32 to index
    %c0_49 = arith.constant 0 : index
    %94 = vector.load %arg7[%93, %c0_49] : memref<64x64xf32, #tpu.memory_space<vmem>>, vector<8x64xf32>
    tpu.vector_store %arg7[%93, %c0_49], %92 {strides = array<i32>} : memref<64x64xf32, #tpu.memory_space<vmem>>, vector<8x64xf32>,
    %c2_i32_50 = arith.constant 2 : i32
    %c8_i32_51 = arith.constant 8 : i32
    %95 = arith.muli %c2_i32_50, %c8_i32_51 : i32
    %96 = tpu.assume_multiple %95, 8 : i32
    %c7_i32_52 = arith.constant 7 : i32
    %97 = arith.subi %c7_i32_52, %c2_i32_50 : i32
    %c8_i32_53 = arith.constant 8 : i32
    %98 = arith.muli %97, %c8_i32_53 : i32
    %99 = tpu.assume_multiple %98, 8 : i32
    %100 = arith.index_cast %99 : i32 to index
    %c0_54 = arith.constant 0 : index
    %101 = vector.load %arg6[%100, %c0_54] : memref<64x64xf32, #tpu.memory_space<vmem>>, vector<8x64xf32>
    %102 = arith.index_cast %96 : i32 to index
    %c0_55 = arith.constant 0 : index
    %103 = vector.load %arg7[%102, %c0_55] : memref<64x64xf32, #tpu.memory_space<vmem>>, vector<8x64xf32>
    tpu.vector_store %arg7[%102, %c0_55], %101 {strides = array<i32>} : memref<64x64xf32, #tpu.memory_space<vmem>>, vector<8x64xf32>,
    %c3_i32_56 = arith.constant 3 : i32
    %c8_i32_57 = arith.constant 8 : i32
    %104 = arith.muli %c3_i32_56, %c8_i32_57 : i32
    %105 = tpu.assume_multiple %104, 8 : i32
    %c7_i32_58 = arith.constant 7 : i32
    %106 = arith.subi %c7_i32_58, %c3_i32_56 : i32
    %c8_i32_59 = arith.constant 8 : i32
    %107 = arith.muli %106, %c8_i32_59 : i32
    %108 = tpu.assume_multiple %107, 8 : i32
    %109 = arith.index_cast %108 : i32 to index
    %c0_60 = arith.constant 0 : index
    %110 = vector.load %arg6[%109, %c0_60] : memref<64x64xf32, #tpu.memory_space<vmem>>, vector<8x64xf32>
    %111 = arith.index_cast %105 : i32 to index
    %c0_61 = arith.constant 0 : index
    %112 = vector.load %arg7[%111, %c0_61] : memref<64x64xf32, #tpu.memory_space<vmem>>, vector<8x64xf32>
    tpu.vector_store %arg7[%111, %c0_61], %110 {strides = array<i32>} : memref<64x64xf32, #tpu.memory_space<vmem>>, vector<8x64xf32>,
    %c4_i32_62 = arith.constant 4 : i32
    %c8_i32_63 = arith.constant 8 : i32
    %113 = arith.muli %c4_i32_62, %c8_i32_63 : i32
    %114 = tpu.assume_multiple %113, 8 : i32
    %c7_i32_64 = arith.constant 7 : i32
    %115 = arith.subi %c7_i32_64, %c4_i32_62 : i32
    %c8_i32_65 = arith.constant 8 : i32
    %116 = arith.muli %115, %c8_i32_65 : i32
    %117 = tpu.assume_multiple %116, 8 : i32
    %118 = arith.index_cast %117 : i32 to index
    %c0_66 = arith.constant 0 : index
    %119 = vector.load %arg6[%118, %c0_66] : memref<64x64xf32, #tpu.memory_space<vmem>>, vector<8x64xf32>
    %120 = arith.index_cast %114 : i32 to index
    %c0_67 = arith.constant 0 : index
    %121 = vector.load %arg7[%120, %c0_67] : memref<64x64xf32, #tpu.memory_space<vmem>>, vector<8x64xf32>
    tpu.vector_store %arg7[%120, %c0_67], %119 {strides = array<i32>} : memref<64x64xf32, #tpu.memory_space<vmem>>, vector<8x64xf32>,
    %c5_i32_68 = arith.constant 5 : i32
    %c8_i32_69 = arith.constant 8 : i32
    %122 = arith.muli %c5_i32_68, %c8_i32_69 : i32
    %123 = tpu.assume_multiple %122, 8 : i32
    %c7_i32_70 = arith.constant 7 : i32
    %124 = arith.subi %c7_i32_70, %c5_i32_68 : i32
    %c8_i32_71 = arith.constant 8 : i32
    %125 = arith.muli %124, %c8_i32_71 : i32
    %126 = tpu.assume_multiple %125, 8 : i32
    %127 = arith.index_cast %126 : i32 to index
    %c0_72 = arith.constant 0 : index
    %128 = vector.load %arg6[%127, %c0_72] : memref<64x64xf32, #tpu.memory_space<vmem>>, vector<8x64xf32>
    %129 = arith.index_cast %123 : i32 to index
    %c0_73 = arith.constant 0 : index
    %130 = vector.load %arg7[%129, %c0_73] : memref<64x64xf32, #tpu.memory_space<vmem>>, vector<8x64xf32>
    tpu.vector_store %arg7[%129, %c0_73], %128 {strides = array<i32>} : memref<64x64xf32, #tpu.memory_space<vmem>>, vector<8x64xf32>,
    %c6_i32_74 = arith.constant 6 : i32
    %c8_i32_75 = arith.constant 8 : i32
    %131 = arith.muli %c6_i32_74, %c8_i32_75 : i32
    %132 = tpu.assume_multiple %131, 8 : i32
    %c7_i32_76 = arith.constant 7 : i32
    %133 = arith.subi %c7_i32_76, %c6_i32_74 : i32
    %c8_i32_77 = arith.constant 8 : i32
    %134 = arith.muli %133, %c8_i32_77 : i32
    %135 = tpu.assume_multiple %134, 8 : i32
    %136 = arith.index_cast %135 : i32 to index
    %c0_78 = arith.constant 0 : index
    %137 = vector.load %arg6[%136, %c0_78] : memref<64x64xf32, #tpu.memory_space<vmem>>, vector<8x64xf32>
    %138 = arith.index_cast %132 : i32 to index
    %c0_79 = arith.constant 0 : index
    %139 = vector.load %arg7[%138, %c0_79] : memref<64x64xf32, #tpu.memory_space<vmem>>, vector<8x64xf32>
    tpu.vector_store %arg7[%138, %c0_79], %137 {strides = array<i32>} : memref<64x64xf32, #tpu.memory_space<vmem>>, vector<8x64xf32>,
    %c7_i32_80 = arith.constant 7 : i32
    %c8_i32_81 = arith.constant 8 : i32
    %140 = arith.muli %c7_i32_80, %c8_i32_81 : i32
    %141 = tpu.assume_multiple %140, 8 : i32
    %c7_i32_82 = arith.constant 7 : i32
    %142 = arith.subi %c7_i32_82, %c7_i32_80 : i32
    %c8_i32_83 = arith.constant 8 : i32
    %143 = arith.muli %142, %c8_i32_83 : i32
    %144 = tpu.assume_multiple %143, 8 : i32
    %145 = arith.index_cast %144 : i32 to index
    %c0_84 = arith.constant 0 : index
    %146 = vector.load %arg6[%145, %c0_84] : memref<64x64xf32, #tpu.memory_space<vmem>>, vector<8x64xf32>
    %147 = arith.index_cast %141 : i32 to index
    %c0_85 = arith.constant 0 : index
    %148 = vector.load %arg7[%147, %c0_85] : memref<64x64xf32, #tpu.memory_space<vmem>>, vector<8x64xf32>
    tpu.vector_store %arg7[%147, %c0_85], %146 {strides = array<i32>} : memref<64x64xf32, #tpu.memory_space<vmem>>, vector<8x64xf32>,
    %c8_i32_86 = arith.constant 8 : i32
    %c0_87 = arith.constant 0 : index
    %c0_88 = arith.constant 0 : index
    %149 = vector.load %arg6[%c0_87, %c0_88] : memref<64x64xf32, #tpu.memory_space<vmem>>, vector<64x64xf32>
    %c0_89 = arith.constant 0 : index
    %c0_90 = arith.constant 0 : index
    %c0_91 = arith.constant 0 : index
    %150 = vector.load %arg2[%c0_89, %c0_90, %c0_91] : memref<1x64x64xf32, #tpu.memory_space<vmem>>, vector<1x64x64xf32>
    %151 = vector.shape_cast %150 : vector<1x64x64xf32> to vector<64x64xf32>
    %cst_92 = arith.constant dense<0.000000e+00> : vector<64x64xf32>
    %152 = tpu.matmul %149, %151, %cst_92 {dimension_numbers = #tpu.dot_dimension_numbers<[1], [0], [0], [1], [0, 0, 1, 1], [], []>} : vector<64x64xf32>, vector<64x64xf32>, vector<64x64xf32> -> vector<64x64xf32>
    %c0_93 = arith.constant 0 : index
    %c0_94 = arith.constant 0 : index
    %153 = vector.load %arg7[%c0_93, %c0_94] : memref<64x64xf32, #tpu.memory_space<vmem>>, vector<64x64xf32>
    %c0_95 = arith.constant 0 : index
    %c0_96 = arith.constant 0 : index
    %c0_97 = arith.constant 0 : index
    %154 = vector.load %arg3[%c0_95, %c0_96, %c0_97] : memref<1x64x64xf32, #tpu.memory_space<vmem>>, vector<1x64x64xf32>
    %155 = vector.shape_cast %154 : vector<1x64x64xf32> to vector<64x64xf32>
    %cst_98 = arith.constant dense<0.000000e+00> : vector<64x64xf32>
    %156 = tpu.matmul %153, %155, %cst_98 {dimension_numbers = #tpu.dot_dimension_numbers<[1], [0], [0], [1], [0, 0, 1, 1], [], []>} : vector<64x64xf32>, vector<64x64xf32>, vector<64x64xf32> -> vector<64x64xf32>
    %157 = arith.addf %152, %156 : vector<64x64xf32>
    %c0_99 = arith.constant 0 : index
    %c0_100 = arith.constant 0 : index
    %c0_101 = arith.constant 0 : index
    %158 = vector.load %arg4[%c0_99, %c0_100, %c0_101] : memref<1x1x64xf32, #tpu.memory_space<vmem>>, vector<1x1x64xf32>
    %159 = vector.shape_cast %158 : vector<1x1x64xf32> to vector<1x64xf32>
    %160 = vector.broadcast %159 : vector<1x64xf32> to vector<64x64xf32>
    %161 = arith.addf %157, %160 : vector<64x64xf32>
    %c0_102 = arith.constant 0 : index
    %c0_103 = arith.constant 0 : index
    %162 = vector.load %arg8[%c0_102, %c0_103] : memref<64x64xf32, #tpu.memory_space<vmem>>, vector<64x64xf32>
    tpu.vector_store %arg8[%c0_102, %c0_103], %161 {strides = array<i32>} : memref<64x64xf32, #tpu.memory_space<vmem>>, vector<64x64xf32>,
    %c1 = arith.constant 1 : index
    %c0_104 = arith.constant 0 : index
    %c0_105 = arith.constant 0 : index
    %163 = vector.load %arg1[%c1, %c0_104, %c0_105] : memref<2x64x64xf32, #tpu.memory_space<vmem>>, vector<1x64x64xf32>
    %164 = vector.shape_cast %163 : vector<1x64x64xf32> to vector<64x64xf32>
    %cst_106 = arith.constant 0.000000e+00 : f32
    %165 = vector.broadcast %cst_106 : f32 to vector<8x64xf32>
    %c0_i32_107 = arith.constant 0 : i32
    %c8_i32_108 = arith.constant 8 : i32
    %166 = arith.muli %c0_i32_107, %c8_i32_108 : i32
    %167 = tpu.assume_multiple %166, 8 : i32
    %168 = arith.index_cast %167 : i32 to index
    %c0_109 = arith.constant 0 : index
    %169 = vector.load %arg8[%168, %c0_109] : memref<64x64xf32, #tpu.memory_space<vmem>>, vector<8x64xf32>
    %cst_110 = arith.constant dense<0.000000e+00> : vector<8x64xf32>
    %170 = tpu.matmul %165, %164, %cst_110 {dimension_numbers = #tpu.dot_dimension_numbers<[1], [0], [0], [1], [0, 0, 1, 1], [], []>} : vector<8x64xf32>, vector<64x64xf32>, vector<8x64xf32> -> vector<8x64xf32>
    %171 = arith.addf %169, %170 : vector<8x64xf32>
    %172 = math.tanh %171 : vector<8x64xf32>
    %173 = arith.index_cast %167 : i32 to index
    %c0_111 = arith.constant 0 : index
    %174 = vector.load %arg6[%173, %c0_111] : memref<64x64xf32, #tpu.memory_space<vmem>>, vector<8x64xf32>
    tpu.vector_store %arg6[%173, %c0_111], %172 {strides = array<i32>} : memref<64x64xf32, #tpu.memory_space<vmem>>, vector<8x64xf32>,
    %c1_i32_112 = arith.constant 1 : i32
    %c8_i32_113 = arith.constant 8 : i32
    %175 = arith.muli %c1_i32_112, %c8_i32_113 : i32
    %176 = tpu.assume_multiple %175, 8 : i32
    %177 = arith.index_cast %176 : i32 to index
    %c0_114 = arith.constant 0 : index
    %178 = vector.load %arg8[%177, %c0_114] : memref<64x64xf32, #tpu.memory_space<vmem>>, vector<8x64xf32>
    %cst_115 = arith.constant dense<0.000000e+00> : vector<8x64xf32>
    %179 = tpu.matmul %172, %164, %cst_115 {dimension_numbers = #tpu.dot_dimension_numbers<[1], [0], [0], [1], [0, 0, 1, 1], [], []>} : vector<8x64xf32>, vector<64x64xf32>, vector<8x64xf32> -> vector<8x64xf32>
    %180 = arith.addf %178, %179 : vector<8x64xf32>
    %181 = math.tanh %180 : vector<8x64xf32>
    %182 = arith.index_cast %176 : i32 to index
    %c0_116 = arith.constant 0 : index
    %183 = vector.load %arg6[%182, %c0_116] : memref<64x64xf32, #tpu.memory_space<vmem>>, vector<8x64xf32>
    tpu.vector_store %arg6[%182, %c0_116], %181 {strides = array<i32>} : memref<64x64xf32, #tpu.memory_space<vmem>>, vector<8x64xf32>,
    %c2_i32_117 = arith.constant 2 : i32
    %c8_i32_118 = arith.constant 8 : i32
    %184 = arith.muli %c2_i32_117, %c8_i32_118 : i32
    %185 = tpu.assume_multiple %184, 8 : i32
    %186 = arith.index_cast %185 : i32 to index
    %c0_119 = arith.constant 0 : index
    %187 = vector.load %arg8[%186, %c0_119] : memref<64x64xf32, #tpu.memory_space<vmem>>, vector<8x64xf32>
    %cst_120 = arith.constant dense<0.000000e+00> : vector<8x64xf32>
    %188 = tpu.matmul %181, %164, %cst_120 {dimension_numbers = #tpu.dot_dimension_numbers<[1], [0], [0], [1], [0, 0, 1, 1], [], []>} : vector<8x64xf32>, vector<64x64xf32>, vector<8x64xf32> -> vector<8x64xf32>
    %189 = arith.addf %187, %188 : vector<8x64xf32>
    %190 = math.tanh %189 : vector<8x64xf32>
    %191 = arith.index_cast %185 : i32 to index
    %c0_121 = arith.constant 0 : index
    %192 = vector.load %arg6[%191, %c0_121] : memref<64x64xf32, #tpu.memory_space<vmem>>, vector<8x64xf32>
    tpu.vector_store %arg6[%191, %c0_121], %190 {strides = array<i32>} : memref<64x64xf32, #tpu.memory_space<vmem>>, vector<8x64xf32>,
    %c3_i32_122 = arith.constant 3 : i32
    %c8_i32_123 = arith.constant 8 : i32
    %193 = arith.muli %c3_i32_122, %c8_i32_123 : i32
    %194 = tpu.assume_multiple %193, 8 : i32
    %195 = arith.index_cast %194 : i32 to index
    %c0_124 = arith.constant 0 : index
    %196 = vector.load %arg8[%195, %c0_124] : memref<64x64xf32, #tpu.memory_space<vmem>>, vector<8x64xf32>
    %cst_125 = arith.constant dense<0.000000e+00> : vector<8x64xf32>
    %197 = tpu.matmul %190, %164, %cst_125 {dimension_numbers = #tpu.dot_dimension_numbers<[1], [0], [0], [1], [0, 0, 1, 1], [], []>} : vector<8x64xf32>, vector<64x64xf32>, vector<8x64xf32> -> vector<8x64xf32>
    %198 = arith.addf %196, %197 : vector<8x64xf32>
    %199 = math.tanh %198 : vector<8x64xf32>
    %200 = arith.index_cast %194 : i32 to index
    %c0_126 = arith.constant 0 : index
    %201 = vector.load %arg6[%200, %c0_126] : memref<64x64xf32, #tpu.memory_space<vmem>>, vector<8x64xf32>
    tpu.vector_store %arg6[%200, %c0_126], %199 {strides = array<i32>} : memref<64x64xf32, #tpu.memory_space<vmem>>, vector<8x64xf32>,
    %c4_i32_127 = arith.constant 4 : i32
    %c8_i32_128 = arith.constant 8 : i32
    %202 = arith.muli %c4_i32_127, %c8_i32_128 : i32
    %203 = tpu.assume_multiple %202, 8 : i32
    %204 = arith.index_cast %203 : i32 to index
    %c0_129 = arith.constant 0 : index
    %205 = vector.load %arg8[%204, %c0_129] : memref<64x64xf32, #tpu.memory_space<vmem>>, vector<8x64xf32>
    %cst_130 = arith.constant dense<0.000000e+00> : vector<8x64xf32>
    %206 = tpu.matmul %199, %164, %cst_130 {dimension_numbers = #tpu.dot_dimension_numbers<[1], [0], [0], [1], [0, 0, 1, 1], [], []>} : vector<8x64xf32>, vector<64x64xf32>, vector<8x64xf32> -> vector<8x64xf32>
    %207 = arith.addf %205, %206 : vector<8x64xf32>
    %208 = math.tanh %207 : vector<8x64xf32>
    %209 = arith.index_cast %203 : i32 to index
    %c0_131 = arith.constant 0 : index
    %210 = vector.load %arg6[%209, %c0_131] : memref<64x64xf32, #tpu.memory_space<vmem>>, vector<8x64xf32>
    tpu.vector_store %arg6[%209, %c0_131], %208 {strides = array<i32>} : memref<64x64xf32, #tpu.memory_space<vmem>>, vector<8x64xf32>,
    %c5_i32_132 = arith.constant 5 : i32
    %c8_i32_133 = arith.constant 8 : i32
    %211 = arith.muli %c5_i32_132, %c8_i32_133 : i32
    %212 = tpu.assume_multiple %211, 8 : i32
    %213 = arith.index_cast %212 : i32 to index
    %c0_134 = arith.constant 0 : index
    %214 = vector.load %arg8[%213, %c0_134] : memref<64x64xf32, #tpu.memory_space<vmem>>, vector<8x64xf32>
    %cst_135 = arith.constant dense<0.000000e+00> : vector<8x64xf32>
    %215 = tpu.matmul %208, %164, %cst_135 {dimension_numbers = #tpu.dot_dimension_numbers<[1], [0], [0], [1], [0, 0, 1, 1], [], []>} : vector<8x64xf32>, vector<64x64xf32>, vector<8x64xf32> -> vector<8x64xf32>
    %216 = arith.addf %214, %215 : vector<8x64xf32>
    %217 = math.tanh %216 : vector<8x64xf32>
    %218 = arith.index_cast %212 : i32 to index
    %c0_136 = arith.constant 0 : index
    %219 = vector.load %arg6[%218, %c0_136] : memref<64x64xf32, #tpu.memory_space<vmem>>, vector<8x64xf32>
    tpu.vector_store %arg6[%218, %c0_136], %217 {strides = array<i32>} : memref<64x64xf32, #tpu.memory_space<vmem>>, vector<8x64xf32>,
    %c6_i32_137 = arith.constant 6 : i32
    %c8_i32_138 = arith.constant 8 : i32
    %220 = arith.muli %c6_i32_137, %c8_i32_138 : i32
    %221 = tpu.assume_multiple %220, 8 : i32
    %222 = arith.index_cast %221 : i32 to index
    %c0_139 = arith.constant 0 : index
    %223 = vector.load %arg8[%222, %c0_139] : memref<64x64xf32, #tpu.memory_space<vmem>>, vector<8x64xf32>
    %cst_140 = arith.constant dense<0.000000e+00> : vector<8x64xf32>
    %224 = tpu.matmul %217, %164, %cst_140 {dimension_numbers = #tpu.dot_dimension_numbers<[1], [0], [0], [1], [0, 0, 1, 1], [], []>} : vector<8x64xf32>, vector<64x64xf32>, vector<8x64xf32> -> vector<8x64xf32>
    %225 = arith.addf %223, %224 : vector<8x64xf32>
    %226 = math.tanh %225 : vector<8x64xf32>
    %227 = arith.index_cast %221 : i32 to index
    %c0_141 = arith.constant 0 : index
    %228 = vector.load %arg6[%227, %c0_141] : memref<64x64xf32, #tpu.memory_space<vmem>>, vector<8x64xf32>
    tpu.vector_store %arg6[%227, %c0_141], %226 {strides = array<i32>} : memref<64x64xf32, #tpu.memory_space<vmem>>, vector<8x64xf32>,
    %c7_i32_142 = arith.constant 7 : i32
    %c8_i32_143 = arith.constant 8 : i32
    %229 = arith.muli %c7_i32_142, %c8_i32_143 : i32
    %230 = tpu.assume_multiple %229, 8 : i32
    %231 = arith.index_cast %230 : i32 to index
    %c0_144 = arith.constant 0 : index
    %232 = vector.load %arg8[%231, %c0_144] : memref<64x64xf32, #tpu.memory_space<vmem>>, vector<8x64xf32>
    %cst_145 = arith.constant dense<0.000000e+00> : vector<8x64xf32>
    %233 = tpu.matmul %226, %164, %cst_145 {dimension_numbers = #tpu.dot_dimension_numbers<[1], [0], [0], [1], [0, 0, 1, 1], [], []>} : vector<8x64xf32>, vector<64x64xf32>, vector<8x64xf32> -> vector<8x64xf32>
    %234 = arith.addf %232, %233 : vector<8x64xf32>
    %235 = math.tanh %234 : vector<8x64xf32>
    %236 = arith.index_cast %230 : i32 to index
    %c0_146 = arith.constant 0 : index
    %237 = vector.load %arg6[%236, %c0_146] : memref<64x64xf32, #tpu.memory_space<vmem>>, vector<8x64xf32>
    tpu.vector_store %arg6[%236, %c0_146], %235 {strides = array<i32>} : memref<64x64xf32, #tpu.memory_space<vmem>>, vector<8x64xf32>,
    %c8_i32_147 = arith.constant 8 : i32
    %c56_i32 = arith.constant 56 : i32
    %238 = tpu.assume_multiple %c56_i32, 8 : i32
    %239 = arith.index_cast %238 : i32 to index
    %c0_148 = arith.constant 0 : index
    %240 = vector.load %arg6[%239, %c0_148] : memref<64x64xf32, #tpu.memory_space<vmem>>, vector<8x32xf32>
    %c0_149 = arith.constant 0 : index
    %c0_150 = arith.constant 0 : index
    %241 = vector.load %arg5[%c0_149, %c0_150] : memref<8x64xf32, #tpu.memory_space<vmem>>, vector<8x32xf32>
    tpu.vector_store %arg5[%c0_149, %c0_150], %240 {strides = array<i32>} : memref<8x64xf32, #tpu.memory_space<vmem>>, vector<8x32xf32>,
    %c0_151 = arith.constant 0 : index
    %c32 = arith.constant 32 : index
    %242 = vector.load %arg6[%c0_151, %c32] : memref<64x64xf32, #tpu.memory_space<vmem>>, vector<8x32xf32>
    %c0_152 = arith.constant 0 : index
    %c32_153 = arith.constant 32 : index
    %243 = vector.load %arg5[%c0_152, %c32_153] : memref<8x64xf32, #tpu.memory_space<vmem>>, vector<8x32xf32>
    tpu.vector_store %arg5[%c0_152, %c32_153], %242 {strides = array<i32>} : memref<8x64xf32, #tpu.memory_space<vmem>>, vector<8x32xf32>,
    return
  }
}

</mosaic_0001>

<bundles_post_ra>
// kernel: birnn_forward.1
= control target key start
LH: loop header
LB: loop body
LE: loop exit
PB: predicated region body
PF: predicated region fallthrough
CT: control target
= control target key end

     0   :  { %v2485_v0 = vmov 0.0|0.0   ;;  %vm2486_vm0 = vmmov 0   ;;  %v2487_v4 = vmov 0.0   ;;  %vm28_vm1 = vcmask 523264   ;;  %s2923_s1 = inlined_call_operand.vmem [shape: f32[2,64,64], index: 1, kind: input, shape index: {}]   ;;  %s2924_s0 = inlined_call_operand.vmem [shape: f32[64,64], index: 0, kind: input, shape index: {}]   ;;  %s2925_s3 = inlined_call_operand.vmem [shape: f32[1,64,64], index: 3, kind: input, shape index: {}]   ;;  %s2926_s2 = inlined_call_operand.vmem [shape: f32[1,64,64], index: 2, kind: input, shape index: {}]   ;;  %s2927_s4 = inlined_call_operand.vmem [shape: f32[1,1,64], index: 4, kind: input, shape index: {}]   ;;  %s2928_s5 = inlined_call_operand.vmem [shape: f32[8,64], index: 5, kind: output, shape index: {}]  }
   0x1   :  { %2218 = vmatprep.subr.bf16.mxu0 %v2485_v0  ;;  %v37_v1 = vld [vmem:[%s2923_s1] sm:$0xff]  ;;  %v38_v2 = vld [vmem:[%s2923_s1 + $0x8] sm:$0xff]  ;;  %v39_v3 = vld [vmem:[%s2923_s1 + $0x10] sm:$0xff]  ;;  %1874 = vmatprep.mubr.msk.f32.mxu0 %vm2486_vm0, %v2487_v4  ;;  %vm1634_vm2 = vcmask 261120   ;;  %vm1637_vm3 = vcmask 523520  }
   0x2   :  { %v2530_v5 = vpack.c.bf16 %v38_v2, %v37_v1  ;;  %v40_v6 = vld [vmem:[%s2923_s1 + $0x18] sm:$0xff]  ;;  %2230 = vmatprep.subr.bf16.mxu1 %v2485_v0  ;;  %1893 = vmatprep.mubr.msk.f32.mxu1 %vm2486_vm0, %v2487_v4  ;;  %v20_v7 = vld [vmem:[%s2924_s0] sm:$0xff]  ;;  %v42_v10 = vld [vmem:[%s2923_s1 + $0x28] sm:$0xff] }
   0x3   :  { %v2542_v8 = vpack.c.bf16 %v40_v6, %v39_v3  ;;  %29 = vst.msk [vmem:[#allocation4] sm:$0xff] %vm28_vm1, %v20_v7  ;;  %v41_v9 = vld [vmem:[%s2923_s1 + $0x20] sm:$0xff]  ;;  %v43_v12 = vld [vmem:[%s2923_s1 + $0x30] sm:$0xff]  ;;  %v44_v13 = vld [vmem:[%s2923_s1 + $0x38] sm:$0xff] }
   0x4   :  { %2220 = vmatpush3.bf16.msra.mxu0 %v2530_v5  ;;  %2232 = vmatpush3.bf16.msra.mxu1 %v2530_v5  ;;  %v2555_v11 = vpack.c.bf16 %v42_v10, %v41_v9  ;;  %v2567_v14 = vpack.c.bf16 %v44_v13, %v43_v12  ;;  %v21_v15 = vld [vmem:[%s2924_s0 + $0x8] sm:$0xff]  ;;  %v22_v22 = vld [vmem:[%s2924_s0 + $0x10] sm:$0xff]  ;;  %v23_v29 = vld [vmem:[%s2924_s0 + $0x18] sm:$0xff] }
   0x5   :  { %2221 = vmatprep.subr.bf16.mxu0 %v2485_v0  ;;  %2233 = vmatprep.subr.bf16.mxu1 %v2485_v0  ;;  %30 = vst.msk [vmem:[#allocation4 + $0x8] sm:$0xff] %vm28_vm1, %v21_v15  ;;  %31 = vst.msk [vmem:[#allocation4 + $0x10] sm:$0xff] %vm28_vm1, %v22_v22  ;;  %v24_v36 = vld [vmem:[%s2924_s0 + $0x20] sm:$0xff]  ;;  %v25_v43 = vld [vmem:[%s2924_s0 + $0x28] sm:$0xff] }
   0x6   :  { %32 = vst.msk [vmem:[#allocation4 + $0x18] sm:$0xff] %vm28_vm1, %v23_v29  ;;  %33 = vst.msk [vmem:[#allocation4 + $0x20] sm:$0xff] %vm28_vm1, %v24_v36  ;;  %v26_v50 = vld [vmem:[%s2924_s0 + $0x30] sm:$0xff]  ;;  %v27_v57 = vld [vmem:[%s2924_s0 + $0x38] sm:$0xff] }
   0x7   :  { %34 = vst.msk [vmem:[#allocation4 + $0x28] sm:$0xff] %vm28_vm1, %v25_v43  ;;  %35 = vst.msk [vmem:[#allocation4 + $0x30] sm:$0xff] %vm28_vm1, %v26_v50  ;;  %v722_v1 = vld [vmem:[%s2925_s3] sm:$0xff]  ;;  %v723_v2 = vld [vmem:[%s2925_s3 + $0x8] sm:$0xff] }
   0x8   :  { %2223 = vmatpush3.bf16.msra.mxu0 %v2542_v8  ;;  %2235 = vmatpush3.bf16.msra.mxu1 %v2542_v8  ;;  %36 = vst.msk [vmem:[#allocation4 + $0x38] sm:$0xff] %vm28_vm1, %v27_v57  ;;  %v2314_v3 = vpack.c.bf16 %v723_v2, %v722_v1  ;;  %v725_v6 = vld [vmem:[%s2925_s3 + $0x18] sm:$0xff]  ;;  %v726_v7 = vld [vmem:[%s2925_s3 + $0x20] sm:$0xff]  ;;  %v727_v9 = vld [vmem:[%s2925_s3 + $0x28] sm:$0xff] }
   0x9   :  { %2224 = vmatprep.subr.bf16.mxu0 %v2485_v0  ;;  %2236 = vmatprep.subr.bf16.mxu1 %v2485_v0  ;;  %v2322_v10 = vpack.c.bf16 %v727_v9, %v726_v7  ;;  %v729_v12 = vld [vmem:[%s2925_s3 + $0x38] sm:$0xff]  ;;  %v707_v15 = vld [vmem:[%s2926_s2 + $0x8] sm:$0xff]  ;;  %v712_v50 = vld [vmem:[%s2926_s2 + $0x30] sm:$0xff] }
   0xa   :  { %v45_v16 = vld [vmem:[#allocation4] sm:$0xff]  ;;  %v1670_v22 = vld [vmem:[%s2923_s1 + $0x58] sm:$0xff] }
   0xb   :  { %v1674_v29 = vld [vmem:[%s2923_s1 + $0x78] sm:$0xff] }
   0xc   :  { %2226 = vmatpush3.bf16.msra.mxu0 %v2555_v11  ;;  %2238 = vmatpush3.bf16.msra.mxu1 %v2555_v11  ;;  %v123_v23 = vld [vmem:[#allocation4 + $0x8] sm:$0xff]  ;;  %v202_v30 = vld [vmem:[#allocation4 + $0x10] sm:$0xff] }
   0xd   :  { %2227 = vmatprep.subr.bf16.mxu0 %v2485_v0  ;;  %2239 = vmatprep.subr.bf16.mxu1 %v2485_v0  ;;  %v281_v37 = vld [vmem:[#allocation4 + $0x18] sm:$0xff]  ;;  %v360_v44 = vld [vmem:[#allocation4 + $0x20] sm:$0xff] }
   0xe   :  { %v439_v51 = vld [vmem:[#allocation4 + $0x28] sm:$0xff]  ;;  %v518_v58 = vld [vmem:[#allocation4 + $0x30] sm:$0xff] }
  0x10   :  { %2229 = vmatpush3.bf16.msra.mxu0 %v2567_v14  ;;  %2241 = vmatpush3.bf16.msra.mxu1 %v2567_v14 }
  0x11   :  { %2242 = vmatprep.subr.bf16.mxu0 %v2485_v0  ;;  %2254 = vmatprep.subr.bf16.mxu1 %v2485_v0 }
  0x13   :  { %1875 = vmatmul.mubr.f32.vlgmr.msra.gmra.mrb[0].mxu0 %v2487_v4 }
  0x14   :  { %2244 = vmatpush3.bf16.msra.mxu0 %v2530_v5  ;;  %1912 = vmatprep.mubr.msk.f32.mxu0 %vm2486_vm0, %v2487_v4 }
  0x15   :  { %2245 = vmatprep.subr.bf16.mxu0 %v2485_v0 }
  0x18   :  { %2247 = vmatpush3.bf16.msra.mxu0 %v2542_v8 }
  0x19   :  { %2248 = vmatprep.subr.bf16.mxu0 %v2485_v0 }
  0x1c   :  { %2250 = vmatpush3.bf16.msra.mxu0 %v2555_v11 }
  0x1d   :  { %2251 = vmatprep.subr.bf16.mxu0 %v2485_v0 }
  0x20   :  { %2253 = vmatpush3.bf16.msra.mxu0 %v2567_v14 }
  0x21   :  { %2266 = vmatprep.subr.bf16.mxu0 %v2485_v0 }
  0xe6   :  { %v115_v17 = vpop.f32.mrb[0].mxu0 }
  0xe7   :  { %v119_v18 = vadd.f32 %v115_v17, %v45_v16  ;;  %v1876_v19 = vpop.f32.mrb[1].mxu0  ;;  %v1667_v17 = vld [vmem:[%s2923_s1 + $0x40] sm:$0xff] }
  0xe9   :  { %2453 = vtanh.f32 %v119_v18  ;;  %v1668_v18 = vld [vmem:[%s2923_s1 + $0x48] sm:$0xff] }
  0xea   :  { %v2744_v19 = vpack.c.bf16 %v1668_v18, %v1667_v17 }
  0xf3   :  { %v2454_v20 = vpop.eup %2453 }
  0xf4   :  { %121 = vst.msk [vmem:[#allocation2] sm:$0xff] %vm28_vm1, %v2454_v20  ;;  %1894 = vmatmul.mubr.msk.f32.vlgmr.msra.gmra.mrb[0].mxu1 %vm28_vm1, %v2454_v20  ;;  %v1669_v20 = vld [vmem:[%s2923_s1 + $0x50] sm:$0xff] }
  0xf5   :  { %2256 = vmatpush3.bf16.msra.mxu1 %v2530_v5  ;;  %1931 = vmatprep.mubr.msk.f32.mxu1 %vm2486_vm0, %v2487_v4 }
  0xf6   :  { %2257 = vmatprep.subr.bf16.mxu1 %v2485_v0 }
  0xf9   :  { %2259 = vmatpush3.bf16.msra.mxu1 %v2542_v8 }
  0xfa   :  { %2260 = vmatprep.subr.bf16.mxu1 %v2485_v0 }
  0xfb   :  { %v2599_v21 = vld [vmem:[#allocation2] sm:$0xff] }
  0xfc   :  { %697 = vst.msk [vmem:[#allocation3 + $0x38] sm:$0xff] %vm28_vm1, %v2599_v21 }
  0xfd   :  { %2262 = vmatpush3.bf16.msra.mxu1 %v2555_v11 }
  0xfe   :  { %2263 = vmatprep.subr.bf16.mxu1 %v2485_v0 }
 0x101   :  { %2265 = vmatpush3.bf16.msra.mxu1 %v2567_v14 }
 0x102   :  { %2278 = vmatprep.subr.bf16.mxu1 %v2485_v0 }
 0x103   :  { %v721_v57 = vld [vmem:[#allocation3 + $0x38] sm:$0xff] }
 0x1c7   :  { %v193_v24 = vpop.f32.mrb[0].mxu1 }
 0x1c8   :  { %v197_v25 = vadd.f32 %v193_v24, %v123_v23  ;;  %v1895_v26 = vpop.f32.mrb[1].mxu1  ;;  %v2754_v23 = vpack.c.bf16 %v1670_v22, %v1669_v20  ;;  %v1671_v24 = vld [vmem:[%s2923_s1 + $0x60] sm:$0xff] }
 0x1ca   :  { %2455 = vtanh.f32 %v197_v25  ;;  %v1672_v25 = vld [vmem:[%s2923_s1 + $0x68] sm:$0xff] }
 0x1cb   :  { %v2764_v26 = vpack.c.bf16 %v1672_v25, %v1671_v24 }
 0x1d4   :  { %v2456_v27 = vpop.eup %2455 }
 0x1d5   :  { %200 = vst.msk [vmem:[#allocation2 + $0x8] sm:$0xff] %vm28_vm1, %v2456_v27  ;;  %1913 = vmatmul.mubr.msk.f32.vlgmr.msra.gmra.mrb[2].mxu0 %vm28_vm1, %v2456_v27  ;;  %v1673_v27 = vld [vmem:[%s2923_s1 + $0x70] sm:$0xff] }
 0x1d6   :  { %2268 = vmatpush3.bf16.msra.mxu0 %v2530_v5  ;;  %1950 = vmatprep.mubr.msk.f32.mxu0 %vm2486_vm0, %v2487_v4 }
 0x1d7   :  { %2269 = vmatprep.subr.bf16.mxu0 %v2485_v0 }
 0x1da   :  { %2271 = vmatpush3.bf16.msra.mxu0 %v2542_v8 }
 0x1db   :  { %2272 = vmatprep.subr.bf16.mxu0 %v2485_v0 }
 0x1dc   :  { %v2619_v28 = vld [vmem:[#allocation2 + $0x8] sm:$0xff] }
 0x1dd   :  { %694 = vst.msk [vmem:[#allocation3 + $0x30] sm:$0xff] %vm28_vm1, %v2619_v28 }
 0x1de   :  { %2274 = vmatpush3.bf16.msra.mxu0 %v2555_v11 }
 0x1df   :  { %2275 = vmatprep.subr.bf16.mxu0 %v2485_v0 }
 0x1e2   :  { %2277 = vmatpush3.bf16.msra.mxu0 %v2567_v14 }
 0x1e3   :  { %2290 = vmatprep.subr.bf16.mxu0 %v2485_v0 }
 0x2a8   :  { %v272_v31 = vpop.f32.mrb[2].mxu0 }
 0x2a9   :  { %v276_v32 = vadd.f32 %v272_v31, %v202_v30  ;;  %v1914_v33 = vpop.f32.mrb[3].mxu0  ;;  %v2774_v30 = vpack.c.bf16 %v1674_v29, %v1673_v27  ;;  %v597_v31 = vld [vmem:[#allocation4 + $0x38] sm:$0xff] }
 0x2ab   :  { %2457 = vtanh.f32 %v276_v32 }
 0x2b5   :  { %v2458_v34 = vpop.eup %2457 }
 0x2b6   :  { %279 = vst.msk [vmem:[#allocation2 + $0x10] sm:$0xff] %vm28_vm1, %v2458_v34  ;;  %1932 = vmatmul.mubr.msk.f32.vlgmr.msra.gmra.mrb[2].mxu1 %vm28_vm1, %v2458_v34 }
 0x2b7   :  { %2280 = vmatpush3.bf16.msra.mxu1 %v2530_v5  ;;  %1969 = vmatprep.mubr.msk.f32.mxu1 %vm2486_vm0, %v2487_v4 }
 0x2b8   :  { %2281 = vmatprep.subr.bf16.mxu1 %v2485_v0 }
 0x2bb   :  { %2283 = vmatpush3.bf16.msra.mxu1 %v2542_v8 }
 0x2bc   :  { %2284 = vmatprep.subr.bf16.mxu1 %v2485_v0 }
 0x2bd   :  { %v2639_v35 = vld [vmem:[#allocation2 + $0x10] sm:$0xff] }
 0x2be   :  { %691 = vst.msk [vmem:[#allocation3 + $0x28] sm:$0xff] %vm28_vm1, %v2639_v35 }
 0x2bf   :  { %2286 = vmatpush3.bf16.msra.mxu1 %v2555_v11 }
 0x2c0   :  { %2287 = vmatprep.subr.bf16.mxu1 %v2485_v0 }
 0x2c3   :  { %2289 = vmatpush3.bf16.msra.mxu1 %v2567_v14 }
 0x2c4   :  { %2302 = vmatprep.subr.bf16.mxu1 %v2485_v0 }
 0x389   :  { %v351_v38 = vpop.f32.mrb[2].mxu1 }
 0x38a   :  { %v355_v39 = vadd.f32 %v351_v38, %v281_v37  ;;  %v1933_v40 = vpop.f32.mrb[3].mxu1  ;;  %v708_v38 = vld [vmem:[%s2926_s2 + $0x10] sm:$0xff] }
 0x38c   :  { %2459 = vtanh.f32 %v355_v39  ;;  %v709_v39 = vld [vmem:[%s2926_s2 + $0x18] sm:$0xff] }
 0x396   :  { %v2460_v41 = vpop.eup %2459 }
 0x397   :  { %358 = vst.msk [vmem:[#allocation2 + $0x18] sm:$0xff] %vm28_vm1, %v2460_v41  ;;  %1951 = vmatmul.mubr.msk.f32.vlgmr.msra.gmra.mrb[4].mxu0 %vm28_vm1, %v2460_v41  ;;  %v2334_v41 = vpack.c.bf16 %v709_v39, %v708_v38 }
 0x398   :  { %2292 = vmatpush3.bf16.msra.mxu0 %v2530_v5  ;;  %1988 = vmatprep.mubr.msk.f32.mxu0 %vm2486_vm0, %v2487_v4 }
 0x399   :  { %2293 = vmatprep.subr.bf16.mxu0 %v2485_v0 }
 0x39c   :  { %2295 = vmatpush3.bf16.msra.mxu0 %v2542_v8 }
 0x39d   :  { %2296 = vmatprep.subr.bf16.mxu0 %v2485_v0 }
 0x39e   :  { %v2659_v42 = vld [vmem:[#allocation2 + $0x18] sm:$0xff] }
 0x39f   :  { %688 = vst.msk [vmem:[#allocation3 + $0x20] sm:$0xff] %vm28_vm1, %v2659_v42 }
 0x3a0   :  { %2298 = vmatpush3.bf16.msra.mxu0 %v2555_v11 }
 0x3a1   :  { %2299 = vmatprep.subr.bf16.mxu0 %v2485_v0 }
 0x3a4   :  { %2301 = vmatpush3.bf16.msra.mxu0 %v2567_v14 }
 0x3a5   :  { %2315 = vmatprep.subr.bf16.mxu0 %v2314_v3 }
 0x46a   :  { %v430_v45 = vpop.f32.mrb[4].mxu0 }
 0x46b   :  { %v434_v46 = vadd.f32 %v430_v45, %v360_v44  ;;  %v1952_v47 = vpop.f32.mrb[5].mxu0  ;;  %v710_v44 = vld [vmem:[%s2926_s2 + $0x20] sm:$0xff]  ;;  %v711_v45 = vld [vmem:[%s2926_s2 + $0x28] sm:$0xff] }
 0x46c   :  { %v2338_v47 = vpack.c.bf16 %v711_v45, %v710_v44 }
 0x46d   :  { %2461 = vtanh.f32 %v434_v46 }
 0x477   :  { %v2462_v48 = vpop.eup %2461 }
 0x478   :  { %437 = vst.msk [vmem:[#allocation2 + $0x20] sm:$0xff] %vm28_vm1, %v2462_v48  ;;  %1970 = vmatmul.mubr.msk.f32.vlgmr.msra.gmra.mrb[4].mxu1 %vm28_vm1, %v2462_v48 }
 0x479   :  { %2304 = vmatpush3.bf16.msra.mxu1 %v2530_v5  ;;  %2007 = vmatprep.mubr.msk.f32.mxu1 %vm2486_vm0, %v2487_v4  ;;  %v724_v5 = vld [vmem:[%s2925_s3 + $0x10] sm:$0xff] }
 0x47a   :  { %2305 = vmatprep.subr.bf16.mxu1 %v2485_v0 }
 0x47d   :  { %2307 = vmatpush3.bf16.msra.mxu1 %v2542_v8  ;;  %v2318_v8 = vpack.c.bf16 %v725_v6, %v724_v5 }
 0x47e   :  { %2308 = vmatprep.subr.bf16.mxu1 %v2485_v0 }
 0x47f   :  { %v2678_v49 = vld [vmem:[#allocation2 + $0x20] sm:$0xff] }
 0x480   :  { %685 = vst.msk [vmem:[#allocation3 + $0x18] sm:$0xff] %vm28_vm1, %v2678_v49 }
 0x481   :  { %2310 = vmatpush3.bf16.msra.mxu1 %v2555_v11  ;;  %v728_v11 = vld [vmem:[%s2925_s3 + $0x30] sm:$0xff] }
 0x482   :  { %2311 = vmatprep.subr.bf16.mxu1 %v2485_v0  ;;  %v2326_v13 = vpack.c.bf16 %v729_v12, %v728_v11 }
 0x485   :  { %2313 = vmatpush3.bf16.msra.mxu1 %v2567_v14  ;;  %v706_v14 = vld [vmem:[%s2926_s2] sm:$0xff] }
 0x486   :  { %2346 = vmatprep.subr.bf16.mxu1 %v2485_v0  ;;  %v2330_v16 = vpack.c.bf16 %v707_v15, %v706_v14 }
 0x487   :  { %v717_v48 = vld [vmem:[#allocation3 + $0x18] sm:$0xff] }
 0x54b   :  { %v509_v52 = vpop.f32.mrb[4].mxu1 }
 0x54c   :  { %v513_v53 = vadd.f32 %v509_v52, %v439_v51  ;;  %v1971_v54 = vpop.f32.mrb[5].mxu1  ;;  %v713_v51 = vld [vmem:[%s2926_s2 + $0x38] sm:$0xff]  ;;  %v718_v52 = vld [vmem:[#allocation3 + $0x20] sm:$0xff] }
 0x54d   :  { %v719_v54 = vld [vmem:[#allocation3 + $0x28] sm:$0xff] }
 0x54e   :  { %2463 = vtanh.f32 %v513_v53  ;;  %v2342_v53 = vpack.c.bf16 %v713_v51, %v712_v50 }
 0x558   :  { %v2464_v55 = vpop.eup %2463 }
 0x559   :  { %516 = vst.msk [vmem:[#allocation2 + $0x28] sm:$0xff] %vm28_vm1, %v2464_v55  ;;  %1989 = vmatmul.mubr.msk.f32.vlgmr.msra.gmra.mrb[6].mxu0 %vm28_vm1, %v2464_v55  ;;  %v720_v55 = vld [vmem:[#allocation3 + $0x30] sm:$0xff] }
 0x55a   :  { %2317 = vmatpush3.bf16.msra.mxu0 %v2314_v3 }
 0x55b   :  { %2319 = vmatprep.subr.bf16.mxu0 %v2318_v8 }
 0x55e   :  { %2321 = vmatpush3.bf16.msra.mxu0 %v2318_v8 }
 0x55f   :  { %2323 = vmatprep.subr.bf16.mxu0 %v2322_v10 }
 0x560   :  { %v2692_v56 = vld [vmem:[#allocation2 + $0x28] sm:$0xff] }
 0x561   :  { %682 = vst.msk [vmem:[#allocation3 + $0x10] sm:$0xff] %vm28_vm1, %v2692_v56 }
 0x562   :  { %2325 = vmatpush3.bf16.msra.mxu0 %v2322_v10 }
 0x563   :  { %2327 = vmatprep.subr.bf16.mxu0 %v2326_v13 }
 0x566   :  { %2329 = vmatpush3.bf16.msra.mxu0 %v2326_v13 }
 0x567   :  { %2331 = vmatprep.subr.bf16.mxu0 %v2330_v16 }
 0x568   :  { %v716_v46 = vld [vmem:[#allocation3 + $0x10] sm:$0xff] }
 0x62c   :  { %v588_v59 = vpop.f32.mrb[6].mxu0 }
 0x62d   :  { %v592_v60 = vadd.f32 %v588_v59, %v518_v58  ;;  %v1990_v61 = vpop.f32.mrb[7].mxu0 }
 0x62f   :  { %2465 = vtanh.f32 %v592_v60 }
 0x639   :  { %v2466_v62 = vpop.eup %2465 }
 0x63a   :  { %595 = vst.msk [vmem:[#allocation2 + $0x30] sm:$0xff] %vm28_vm1, %v2466_v62  ;;  %2008 = vmatmul.mubr.msk.f32.vlgmr.msra.gmra.mrb[6].mxu1 %vm28_vm1, %v2466_v62 }
 0x63b   :  { %2082 = vmatprep.mubr.msk.f32.mxu1 %vm2486_vm0, %v2487_v4  ;;  %2348 = vmatpush3.bf16.msra.mxu1 %v2744_v19 }
 0x63c   :  { %2349 = vmatprep.subr.bf16.mxu1 %v2485_v0 }
 0x63f   :  { %2351 = vmatpush3.bf16.msra.mxu1 %v2754_v23 }
 0x640   :  { %2352 = vmatprep.subr.bf16.mxu1 %v2485_v0 }
 0x641   :  { %v2704_v63 = vld [vmem:[#allocation2 + $0x30] sm:$0xff] }
 0x642   :  { %679 = vst.msk [vmem:[#allocation3 + $0x8] sm:$0xff] %vm28_vm1, %v2704_v63 }
 0x643   :  { %2354 = vmatpush3.bf16.msra.mxu1 %v2764_v26 }
 0x644   :  { %2355 = vmatprep.subr.bf16.mxu1 %v2485_v0 }
 0x647   :  { %2357 = vmatpush3.bf16.msra.mxu1 %v2774_v30 }
 0x648   :  { %2358 = vmatprep.subr.bf16.mxu1 %v2485_v0 }
 0x649   :  { %v715_v43 = vld [vmem:[#allocation3 + $0x8] sm:$0xff] }
 0x64a   :  { %2083 = vmatmul.mubr.f32.vlgmr.msra.gmra.mrb[8].mxu1 %v2487_v4 }
 0x64b   :  { %2360 = vmatpush3.bf16.msra.mxu1 %v2744_v19  ;;  %2101 = vmatprep.mubr.msk.f32.mxu1 %vm2486_vm0, %v2487_v4 }
 0x64c   :  { %2361 = vmatprep.subr.bf16.mxu1 %v2485_v0 }
 0x64f   :  { %2363 = vmatpush3.bf16.msra.mxu1 %v2754_v23 }
 0x650   :  { %2364 = vmatprep.subr.bf16.mxu1 %v2485_v0 }
 0x653   :  { %2366 = vmatpush3.bf16.msra.mxu1 %v2764_v26 }
 0x654   :  { %2367 = vmatprep.subr.bf16.mxu1 %v2485_v0 }
 0x657   :  { %2369 = vmatpush3.bf16.msra.mxu1 %v2774_v30 }
 0x658   :  { %2382 = vmatprep.subr.bf16.mxu1 %v2485_v0 }
 0x70d   :  { %v667_v32 = vpop.f32.mrb[6].mxu1 }
 0x70e   :  { %v671_v33 = vadd.f32 %v667_v32, %v597_v31  ;;  %v2009_v34 = vpop.f32.mrb[7].mxu1 }
 0x710   :  { %2467 = vtanh.f32 %v671_v33 }
 0x71a   :  { %v2468_v36 = vpop.eup %2467 }
 0x71b   :  { %674 = vst.msk [vmem:[#allocation2 + $0x38] sm:$0xff] %vm28_vm1, %v2468_v36 }
 0x722   :  { %v675_v37 = vld [vmem:[#allocation2 + $0x38] sm:$0xff] }
 0x723   :  { %676 = vst.msk [vmem:[#allocation3] sm:$0xff] %vm28_vm1, %v675_v37 }
 0x72a   :  { %v714_v40 = vld [vmem:[#allocation3] sm:$0xff] }
 0x72b   :  { %2026 = vmatprep.mubr.msk.f32.mxu0 %vm28_vm1, %v714_v40 }
 0x72c   :  { %2027 = vmatmul.mubr.msk.f32.vlgmr.msra.gmra.mrb[8].mxu0 %vm28_vm1, %v715_v43 }
 0x72d   :  { %2333 = vmatpush3.bf16.msra.mxu0 %v2330_v16  ;;  %2029 = vmatprep.mubr.msk.f32.mxu0 %vm28_vm1, %v716_v46 }
 0x72e   :  { %2335 = vmatprep.subr.bf16.mxu0 %v2334_v41 }
 0x730   :  { %2030 = vmatmul.mubr.msk.f32.gmra.mrb[10].mxu0 %vm28_vm1, %v717_v48 }
 0x731   :  { %2337 = vmatpush3.bf16.msra.mxu0 %v2334_v41  ;;  %2032 = vmatprep.mubr.msk.f32.mxu0 %vm28_vm1, %v718_v52 }
 0x732   :  { %2339 = vmatprep.subr.bf16.mxu0 %v2338_v47 }
 0x734   :  { %2033 = vmatmul.mubr.msk.f32.gmra.mrb[12].mxu0 %vm28_vm1, %v719_v54 }
 0x735   :  { %2341 = vmatpush3.bf16.msra.mxu0 %v2338_v47  ;;  %2035 = vmatprep.mubr.msk.f32.mxu0 %vm28_vm1, %v720_v55 }
 0x736   :  { %2343 = vmatprep.subr.bf16.mxu0 %v2342_v53 }
 0x738   :  { %2036 = vmatmul.mubr.msk.f32.gmra.mrb[14].mxu0 %vm28_vm1, %v721_v57 }
 0x739   :  { %2345 = vmatpush3.bf16.msra.mxu0 %v2342_v53  ;;  %2054 = vmatprep.mubr.msk.f32.mxu0 %vm28_vm1, %v2599_v21  ;;  %v1087_v21 = vpop.f32.mrb[8].mxu1 }
 0x73a   :  { %2370 = vmatprep.subr.bf16.mxu0 %v2485_v0 }
 0x73c   :  { %2055 = vmatmul.mubr.msk.f32.vlgmr.msra.gmra.mrb[8].mxu0 %vm28_vm1, %v2619_v28  ;;  %v2084_v28 = vpop.f32.mrb[9].mxu1 }
 0x73d   :  { %2057 = vmatprep.mubr.msk.f32.mxu0 %vm28_vm1, %v2639_v35  ;;  %2372 = vmatpush3.bf16.msra.mxu0 %v2744_v19  ;;  %v1666_v35 = vld [vmem:[%s2927_s4] ss:$0 sm:$0xff] }
 0x73e   :  { %2373 = vmatprep.subr.bf16.mxu0 %v2485_v0 }
 0x740   :  { %2058 = vmatmul.mubr.msk.f32.gmra.mrb[10].mxu0 %vm28_vm1, %v2659_v42 }
 0x741   :  { %2060 = vmatprep.mubr.msk.f32.mxu0 %vm28_vm1, %v2678_v49  ;;  %2375 = vmatpush3.bf16.msra.mxu0 %v2754_v23 }
 0x742   :  { %2376 = vmatprep.subr.bf16.mxu0 %v2485_v0 }
 0x744   :  { %2061 = vmatmul.mubr.msk.f32.gmra.mrb[12].mxu0 %vm28_vm1, %v2692_v56 }
 0x745   :  { %2063 = vmatprep.mubr.msk.f32.mxu0 %vm28_vm1, %v2704_v63  ;;  %2378 = vmatpush3.bf16.msra.mxu0 %v2764_v26 }
 0x746   :  { %2379 = vmatprep.subr.bf16.mxu0 %v2485_v0 }
 0x748   :  { %2064 = vmatmul.mubr.msk.f32.gmra.mrb[14].mxu0 %vm28_vm1, %v675_v37 }
 0x749   :  { %2381 = vmatpush3.bf16.msra.mxu0 %v2774_v30  ;;  %2120 = vmatprep.mubr.msk.f32.mxu0 %vm2486_vm0, %v2487_v4 }
 0x74a   :  { %2394 = vmatprep.subr.bf16.mxu0 %v2485_v0 }
 0x80f   :  { %v2056_v42 = vpop.f32.mrb[8].mxu0 }
 0x810   :  { %v996_v49 = vadd.f32 %v2056_v42, %v1666_v35  ;;  %v949_v56 = vpop.f32.mrb[9].mxu0 }
 0x811   :  { %v995_v58 = vadd.f32 %v1666_v35, %v949_v56 }
 0x812   :  { %1004 = vst.msk [vmem:[#allocation4 + $0x8] sm:$0xff] %vm28_vm1, %v996_v49 }
 0x813   :  { %1003 = vst.msk [vmem:[#allocation4] sm:$0xff] %vm28_vm1, %v995_v58  ;;  %v2059_v59 = vpop.f32.mrb[10].mxu0 }
 0x814   :  { %v998_v60 = vadd.f32 %v2059_v59, %v1666_v35  ;;  %v959_v61 = vpop.f32.mrb[11].mxu0 }
 0x815   :  { %v997_v62 = vadd.f32 %v1666_v35, %v959_v61 }
 0x816   :  { %1006 = vst.msk [vmem:[#allocation4 + $0x18] sm:$0xff] %vm28_vm1, %v998_v60 }
 0x817   :  { %1005 = vst.msk [vmem:[#allocation4 + $0x10] sm:$0xff] %vm28_vm1, %v997_v62  ;;  %v2062_v63 = vpop.f32.mrb[12].mxu0 }
 0x818   :  { %v1000_v1 = vadd.f32 %v2062_v63, %v1666_v35  ;;  %v969_v2 = vpop.f32.mrb[13].mxu0 }
 0x819   :  { %v999_v3 = vadd.f32 %v1666_v35, %v969_v2  ;;  %v1094_v12 = vld [vmem:[#allocation4 + $0x8] sm:$0xff] }
 0x81a   :  { %1008 = vst.msk [vmem:[#allocation4 + $0x28] sm:$0xff] %vm28_vm1, %v1000_v1  ;;  %v1020_v5 = vld [vmem:[#allocation4] sm:$0xff] }
 0x81b   :  { %1007 = vst.msk [vmem:[#allocation4 + $0x20] sm:$0xff] %vm28_vm1, %v999_v3  ;;  %v1091_v6 = vadd.f32 %v1087_v21, %v1020_v5  ;;  %v2065_v7 = vpop.f32.mrb[14].mxu0 }
 0x81c   :  { %v1002_v8 = vadd.f32 %v2065_v7, %v1666_v35  ;;  %v979_v9 = vpop.f32.mrb[15].mxu0 }
 0x81d   :  { %2469 = vtanh.f32 %v1091_v6  ;;  %v1001_v10 = vadd.f32 %v1666_v35, %v979_v9  ;;  %v1248_v25 = vld [vmem:[#allocation4 + $0x18] sm:$0xff] }
 0x81e   :  { %1010 = vst.msk [vmem:[#allocation4 + $0x38] sm:$0xff] %vm28_vm1, %v1002_v8  ;;  %v1171_v17 = vld [vmem:[#allocation4 + $0x10] sm:$0xff] }
 0x81f   :  { %1009 = vst.msk [vmem:[#allocation4 + $0x30] sm:$0xff] %vm28_vm1, %v1001_v10 }
 0x821   :  { %v1402_v39 = vld [vmem:[#allocation4 + $0x28] sm:$0xff] }
 0x822   :  { %v1325_v33 = vld [vmem:[#allocation4 + $0x20] sm:$0xff] }
 0x827   :  { %v2470_v11 = vpop.eup %2469 }
 0x828   :  { %1093 = vst.msk [vmem:[#allocation2] sm:$0xff] %vm28_vm1, %v2470_v11  ;;  %2102 = vmatmul.mubr.msk.f32.vlgmr.msra.gmra.mrb[10].mxu1 %vm28_vm1, %v2470_v11 }
 0x829   :  { %2384 = vmatpush3.bf16.msra.mxu1 %v2744_v19  ;;  %2139 = vmatprep.mubr.msk.f32.mxu1 %vm2486_vm0, %v2487_v4 }
 0x82a   :  { %2385 = vmatprep.subr.bf16.mxu1 %v2485_v0 }
 0x82d   :  { %2387 = vmatpush3.bf16.msra.mxu1 %v2754_v23 }
 0x82e   :  { %2388 = vmatprep.subr.bf16.mxu1 %v2485_v0 }
 0x82f   :  { %v1636_v51 = vld [vmem:[#allocation2] sm:$0xff] }
 0x831   :  { %2390 = vmatpush3.bf16.msra.mxu1 %v2764_v26 }
 0x832   :  { %2391 = vmatprep.subr.bf16.mxu1 %v2485_v0 }
 0x835   :  { %2393 = vmatpush3.bf16.msra.mxu1 %v2774_v30 }
 0x836   :  { %2406 = vmatprep.subr.bf16.mxu1 %v2485_v0 }
 0x8fb   :  { %v1164_v13 = vpop.f32.mrb[10].mxu1 }
 0x8fc   :  { %v1168_v14 = vadd.f32 %v1164_v13, %v1094_v12  ;;  %v2103_v15 = vpop.f32.mrb[11].mxu1 }
 0x8fe   :  { %2471 = vtanh.f32 %v1168_v14 }
 0x908   :  { %v2472_v16 = vpop.eup %2471 }
 0x909   :  { %1170 = vst.msk [vmem:[#allocation2 + $0x8] sm:$0xff] %vm28_vm1, %v2472_v16  ;;  %2121 = vmatmul.mubr.msk.f32.vlgmr.msra.gmra.mrb[16].mxu0 %vm28_vm1, %v2472_v16 }
 0x90a   :  { %2396 = vmatpush3.bf16.msra.mxu0 %v2744_v19  ;;  %2158 = vmatprep.mubr.msk.f32.mxu0 %vm2486_vm0, %v2487_v4 }
 0x90b   :  { %2397 = vmatprep.subr.bf16.mxu0 %v2485_v0 }
 0x90e   :  { %2399 = vmatpush3.bf16.msra.mxu0 %v2754_v23 }
 0x90f   :  { %2400 = vmatprep.subr.bf16.mxu0 %v2485_v0 }
 0x912   :  { %2402 = vmatpush3.bf16.msra.mxu0 %v2764_v26 }
 0x913   :  { %2403 = vmatprep.subr.bf16.mxu0 %v2485_v0 }
 0x916   :  { %2405 = vmatpush3.bf16.msra.mxu0 %v2774_v30 }
 0x917   :  { %2418 = vmatprep.subr.bf16.mxu0 %v2485_v0 }
 0x9dc   :  { %v1241_v18 = vpop.f32.mrb[16].mxu0 }
 0x9dd   :  { %v1245_v20 = vadd.f32 %v1241_v18, %v1171_v17  ;;  %v2122_v22 = vpop.f32.mrb[17].mxu0 }
 0x9df   :  { %2473 = vtanh.f32 %v1245_v20 }
 0x9e9   :  { %v2474_v24 = vpop.eup %2473 }
 0x9ea   :  { %1247 = vst.msk [vmem:[#allocation2 + $0x10] sm:$0xff] %vm28_vm1, %v2474_v24  ;;  %2140 = vmatmul.mubr.msk.f32.vlgmr.msra.gmra.mrb[12].mxu1 %vm28_vm1, %v2474_v24 }
 0x9eb   :  { %2408 = vmatpush3.bf16.msra.mxu1 %v2744_v19  ;;  %2177 = vmatprep.mubr.msk.f32.mxu1 %vm2486_vm0, %v2487_v4 }
 0x9ec   :  { %2409 = vmatprep.subr.bf16.mxu1 %v2485_v0 }
 0x9ef   :  { %2411 = vmatpush3.bf16.msra.mxu1 %v2754_v23 }
 0x9f0   :  { %2412 = vmatprep.subr.bf16.mxu1 %v2485_v0 }
 0x9f3   :  { %2414 = vmatpush3.bf16.msra.mxu1 %v2764_v26 }
 0x9f4   :  { %2415 = vmatprep.subr.bf16.mxu1 %v2485_v0 }
 0x9f7   :  { %2417 = vmatpush3.bf16.msra.mxu1 %v2774_v30 }
 0x9f8   :  { %2430 = vmatprep.subr.bf16.mxu1 %v2485_v0 }
 0xabd   :  { %v1318_v27 = vpop.f32.mrb[12].mxu1 }
 0xabe   :  { %v1322_v29 = vadd.f32 %v1318_v27, %v1248_v25  ;;  %v2141_v31 = vpop.f32.mrb[13].mxu1 }
 0xac0   :  { %2475 = vtanh.f32 %v1322_v29 }
 0xaca   :  { %v2476_v32 = vpop.eup %2475 }
 0xacb   :  { %1324 = vst.msk [vmem:[#allocation2 + $0x18] sm:$0xff] %vm28_vm1, %v2476_v32  ;;  %2159 = vmatmul.mubr.msk.f32.vlgmr.msra.gmra.mrb[18].mxu0 %vm28_vm1, %v2476_v32 }
 0xacc   :  { %2420 = vmatpush3.bf16.msra.mxu0 %v2744_v19  ;;  %2196 = vmatprep.mubr.msk.f32.mxu0 %vm2486_vm0, %v2487_v4 }
 0xacd   :  { %2421 = vmatprep.subr.bf16.mxu0 %v2485_v0 }
 0xad0   :  { %2423 = vmatpush3.bf16.msra.mxu0 %v2754_v23 }
 0xad1   :  { %2424 = vmatprep.subr.bf16.mxu0 %v2485_v0 }
 0xad4   :  { %2426 = vmatpush3.bf16.msra.mxu0 %v2764_v26 }
 0xad5   :  { %2427 = vmatprep.subr.bf16.mxu0 %v2485_v0 }
 0xad8   :  { %2429 = vmatpush3.bf16.msra.mxu0 %v2774_v30 }
 0xb9e   :  { %v1395_v34 = vpop.f32.mrb[18].mxu0 }
 0xb9f   :  { %v1399_v36 = vadd.f32 %v1395_v34, %v1325_v33  ;;  %v2160_v37 = vpop.f32.mrb[19].mxu0 }
 0xba1   :  { %2477 = vtanh.f32 %v1399_v36 }
 0xbab   :  { %v2478_v38 = vpop.eup %2477 }
 0xbac   :  { %1401 = vst.msk [vmem:[#allocation2 + $0x20] sm:$0xff] %vm28_vm1, %v2478_v38  ;;  %2178 = vmatmul.mubr.msk.f32.vlgmr.msra.gmra.mrb[14].mxu1 %vm28_vm1, %v2478_v38 }
 0xbad   :  { %2432 = vmatpush3.bf16.msra.mxu1 %v2744_v19  ;;  %2215 = vmatprep.mubr.msk.f32.mxu1 %vm2486_vm0, %v2487_v4  ;;  %v1479_v4 = vld [vmem:[#allocation4 + $0x30] sm:$0xff] }
 0xbae   :  { %2433 = vmatprep.subr.bf16.mxu1 %v2485_v0 }
 0xbb1   :  { %2435 = vmatpush3.bf16.msra.mxu1 %v2754_v23 }
 0xbb2   :  { %2436 = vmatprep.subr.bf16.mxu1 %v2485_v0 }
 0xbb5   :  { %2438 = vmatpush3.bf16.msra.mxu1 %v2764_v26 }
 0xbb6   :  { %2439 = vmatprep.subr.bf16.mxu1 %v2485_v0  ;;  %v1556_v0 = vld [vmem:[#allocation4 + $0x38] sm:$0xff] }
 0xbb9   :  { %2441 = vmatpush3.bf16.msra.mxu1 %v2774_v30 }
 0xc7f   :  { %v1472_v40 = vpop.f32.mrb[14].mxu1 }
 0xc80   :  { %v1476_v41 = vadd.f32 %v1472_v40, %v1402_v39  ;;  %v2179_v43 = vpop.f32.mrb[15].mxu1 }
 0xc82   :  { %2479 = vtanh.f32 %v1476_v41 }
 0xc8c   :  { %v2480_v19 = vpop.eup %2479 }
 0xc8d   :  { %1478 = vst.msk [vmem:[#allocation2 + $0x28] sm:$0xff] %vm28_vm1, %v2480_v19  ;;  %2197 = vmatmul.mubr.msk.f32.vlgmr.msra.gmra.mrb[20].mxu0 %vm28_vm1, %v2480_v19 }
 0xd60   :  { %v1549_v23 = vpop.f32.mrb[20].mxu0 }
 0xd61   :  { %v1553_v44 = vadd.f32 %v1549_v23, %v1479_v4  ;;  %v2198_v45 = vpop.f32.mrb[21].mxu0 }
 0xd63   :  { %2481 = vtanh.f32 %v1553_v44 }
 0xd6d   :  { %v2482_v26 = vpop.eup %2481 }
 0xd6e   :  { %1555 = vst.msk [vmem:[#allocation2 + $0x30] sm:$0xff] %vm28_vm1, %v2482_v26  ;;  %2216 = vmatmul.mubr.msk.f32.vlgmr.msra.gmra.mrb[16].mxu1 %vm28_vm1, %v2482_v26 }
 0xe41   :  { %v1626_v30 = vpop.f32.mrb[16].mxu1 }
 0xe42   :  { %v1630_v46 = vadd.f32 %v1626_v30, %v1556_v0  ;;  %v2217_v47 = vpop.f32.mrb[17].mxu1 }
 0xe44   :  { %2483 = vtanh.f32 %v1630_v46 }
 0xe4e   :  { %v2484_v48 = vpop.eup %2483 }
 0xe4f   :  { %1632 = vst.msk [vmem:[#allocation2 + $0x38] sm:$0xff] %vm28_vm1, %v2484_v48 }
 0xe56   :  { %v1633_v50 = vld [vmem:[#allocation2 + $0x38] sm:$0xff] }
 0xe57   :  { %1635 = vst.msk [vmem:[%s2928_s5] sm:$0xff] %vm1634_vm2, %v1633_v50 }
 0xe58   :  { %1638 = vst.msk [vmem:[%s2928_s5] sm:$0xff] %vm1637_vm3, %v1636_v51 }

</bundles_post_ra>
